<compile_context>
chip_gen: v7x
topology: tpu7x:2x2x1
jax: 0.10.0
libtpu: 0.0.40
codegen_flags: <defaults>
</compile_context>

<pallas_src>
import numpy as np
import jax
import jax.numpy as jnp
from jax.experimental import pallas as pl
from jax.experimental.pallas import tpu as pltpu


# ----------------------------------------------------------------------------
# Kernels
# ----------------------------------------------------------------------------
def _infer_kernel(x_ref, w1_ref, b1_ref, out_ref):
    # predScore = (x @ W^T + b)[:, 1]  -> written as a lane-dense (1, TM) row.
    col = jnp.dot(x_ref[...], w1_ref[...],
                  preferred_element_type=jnp.float32) + b1_ref[...]   # (TM, 1)
    out_ref[...] = col.T                                              # (1, TM)


def _train_kernel(x_ref, wt_ref, b_ref, lab_ref, out_ref):
    x = x_ref[...]                                   # (TM, 256) f32
    logits = jnp.dot(x, wt_ref[...],
                     preferred_element_type=jnp.float32) + b_ref[...]  # (TM, 2)
    # Tiny-result transpose to lane-dense (2, TM); cheaper than transposing the
    # big x tile, and XLU is slack here.
    lt = logits.T                                    # (2, TM)

    l0 = lt[0:1, :]                                  # (1, TM)
    l1 = lt[1:2, :]                                  # (1, TM)

    # numerically-stable 2-class softmax / log-softmax
    m = jnp.maximum(l0, l1)
    e0 = jnp.exp(l0 - m)
    e1 = jnp.exp(l1 - m)
    s = e0 + e1
    inv = 1.0 / s
    sm0 = e0 * inv
    sm1 = e1 * inv
    log_s = jnp.log(s)
    ls0 = (l0 - m) - log_s
    ls1 = (l1 - m) - log_s

    lab = lab_ref[...]                               # (1, TM) int32, -1 = pad
    valid = lab >= 0
    lab_f = lab.astype(jnp.float32)

    # per-row CE contribution; rows beyond the true N (partial x block, label
    # == -1) are select-masked to an exact 0.0, so garbage/NaN from the
    # unspecified OOB x reads never reaches the wrapper-side sums.
    picked = jnp.where(lab == 1, ls1, ls0)
    loss_row = jnp.where(valid, -picked, 0.0)

    # predLabel = round(softmax)[:, 1]  (half-to-even, same as torch.round)
    plabel = jnp.round(sm1)
    correct_row = jnp.where(jnp.logical_and(valid, plabel == lab_f), 1.0, 0.0)

    # single unmasked (8, TM) store: [sm0, sm1, plabel, loss, correct, 0, 0, 0]
    zeros3 = jnp.zeros((3, l0.shape[-1]), jnp.float32)
    out_ref[...] = jnp.concatenate(
        [sm0, sm1, plabel, loss_row, correct_row, zeros3], axis=0)


# ----------------------------------------------------------------------------
# Wrapper
# ----------------------------------------------------------------------------
def _round_up(n, m):
    return ((n + m - 1) // m) * m


def _cdiv(a, b):
    return -(-a // b)


def loss_av_forward(x, wt, b, labels=None, tile_rows=2048):
    """Pallas equivalent of lossAV.forward.

    x      : (N, 1, 256) float32
    wt     : (256, 2)    float32   (FC.weight transposed, i.e. W^T)
    b      : (2,)        float32   (FC.bias)
    labels : (N,) int32 or None
    """
    x2 = x.reshape(x.shape[0], x.shape[-1]).astype(jnp.float32)   # squeeze(1)
    n = x2.shape[0]

    # Tile rows: multiple of 128 (lane-dense output blocks), capped at
    # tile_rows (2048 -> 2 MiB f32 tile, double-buffered = 4 MiB VMEM).
    tm = min(tile_rows, _round_up(n, 128))
    # Ensure >= 2 grid steps when possible so the "parallel" axis can shard
    # across both TensorCores on v7x.
    if n > 128 and _cdiv(n, tm) < 2:
        tm = max(128, _round_up(_cdiv(n, 2), 128))
    num_tiles = _cdiv(n, tm)
    n_out = num_tiles * tm          # lane-padded OUTPUT width; x itself is NOT padded

    params = pltpu.CompilerParams(dimension_semantics=("parallel",))

    if labels is None:
        # inference branch: only logit column 1 is needed
        w1 = wt[:, 1:2].astype(jnp.float32)                        # (256, 1)
        b1 = b[1].reshape(1, 1).astype(jnp.float32)                # (1, 1)
        out = pl.pallas_call(
            _infer_kernel,
            out_shape=jax.ShapeDtypeStruct((1, n_out), jnp.float32),
            grid=(num_tiles,),
            in_specs=[
                pl.BlockSpec((tm, 256), lambda i: (i, 0)),   # partial last block OK
                pl.BlockSpec((256, 1), lambda i: (0, 0)),
                pl.BlockSpec((1, 1), lambda i: (0, 0)),
            ],
            out_specs=pl.BlockSpec((1, tm), lambda i: (0, i)),
            compiler_params=params,
        )(x2, w1, b1)
        # TODO(synk): original returns a detached .cpu().numpy(); we return a
        # device array (host transfer has no Pallas equivalent).
        return out[0, :n]                                          # predScore

    wt2 = wt.astype(jnp.float32)
    b2 = b.reshape(1, 2).astype(jnp.float32)
    # lane-dense label row, -1 marks lanes beyond the true N (tiny array; this
    # does NOT copy x)
    lab_row = jnp.full((1, n_out), -1, jnp.int32)
    lab_row = lab_row.at[0, :n].set(labels.astype(jnp.int32))

    packed = pl.pallas_call(
        _train_kernel,
        out_shape=jax.ShapeDtypeStruct((8, n_out), jnp.float32),
        grid=(num_tiles,),
        in_specs=[
            pl.BlockSpec((tm, 256), lambda i: (i, 0)),       # partial last block OK
            pl.BlockSpec((256, 2), lambda i: (0, 0)),
            pl.BlockSpec((1, 2), lambda i: (0, 0)),
            pl.BlockSpec((1, tm), lambda i: (0, i)),
        ],
        out_specs=pl.BlockSpec((8, tm), lambda i: (0, i)),
        compiler_params=params,
    )(x2, wt2, b2, lab_row)

    score = packed[0:2, :n].T                       # (N, 2)  predScore
    plabel = packed[2, :n]                          # (N,)    predLabel
    nloss = jnp.sum(packed[3, :]) / jnp.float32(n)  # CE mean over true N
    correct = jnp.sum(packed[4, :])                 # correctNum
    return nloss, score, plabel, correct


# ----------------------------------------------------------------------------
# Main
# ----------------------------------------------------------------------------
if __name__ == "__main__":
    key = jax.random.PRNGKey(0)
    k_x, k_w, k_b, k_l = jax.random.split(key, 4)

    N, IN_FEAT, OUT_FEAT = 8, 256, 2

    # deterministic synthetic parameters (nn.Linear(256, 2) shapes)
    bound = 1.0 / np.sqrt(IN_FEAT)
    W = jax.random.uniform(k_w, (OUT_FEAT, IN_FEAT), jnp.float32, -bound, bound)
    bias = jax.random.uniform(k_b, (OUT_FEAT,), jnp.float32, -bound, bound)
    Wt = W.T                                                # (256, 2)

    # inputs: x is (N, 1, 256) like the PyTorch module expects before squeeze(1)
    x = jax.random.normal(k_x, (N, 1, IN_FEAT), jnp.float32)
    labels = jax.random.randint(k_l, (N,), 0, 2, jnp.int32)

    # labels == None branch
    pred_score_only = loss_av_forward(x, Wt, bias, labels=None)
    jax.block_until_ready(pred_score_only)

    # labels provided branch
    nloss, pred_score, pred_label, correct_num = loss_av_forward(
        x, Wt, bias, labels=labels)
    jax.block_until_ready((nloss, pred_score, pred_label, correct_num))

    # quick sanity check against plain-JAX reference
    logits_ref = x.reshape(N, IN_FEAT) @ Wt + bias
    sm_ref = jax.nn.softmax(logits_ref, axis=-1)
    loss_ref = -jnp.mean(
        jnp.take_along_axis(jax.nn.log_softmax(logits_ref, axis=-1),
                            labels[:, None], axis=1))
    assert np.allclose(np.asarray(pred_score_only),
                       np.asarray(logits_ref[:, 1]), atol=1e-5)
    assert np.allclose(np.asarray(pred_score), np.asarray(sm_ref), atol=1e-5)
    assert np.allclose(float(nloss), float(loss_ref), atol=1e-5)
    assert np.allclose(np.asarray(pred_label),
                       np.asarray(jnp.round(sm_ref)[:, 1]), atol=1e-5)
    assert float(correct_num) == float(
        jnp.sum((jnp.round(sm_ref)[:, 1] == labels.astype(jnp.float32))
                .astype(jnp.float32)))

    print("KERNEL_OK")
</pallas_src>

<mosaic_0001>
module attributes {stable_mosaic.version = 11 : i64} {
  func.func @_infer_kernel(%arg0: i32, %arg1: memref<128x256xf32, #tpu.memory_space<vmem>>, %arg2: memref<256x1xf32, #tpu.memory_space<vmem>>, %arg3: memref<1x1xf32, #tpu.memory_space<vmem>>, %arg4: memref<1x128xf32, #tpu.memory_space<vmem>>) attributes {dimension_semantics = [#tpu.dimension_semantics<parallel>], iteration_bounds = array<i64: 1>, scalar_prefetch = 0 : i64, scratch_operands = 0 : i64, tpu.core_type = #tpu.core_type<tc>, window_params = [{transform_indices = @transform_0, window_bounds = array<i64: 128, 256>}, {pipeline_mode = #tpu.pipeline_mode<synchronous>, transform_indices = @transform_1, window_bounds = array<i64: 256, 1>}, {pipeline_mode = #tpu.pipeline_mode<synchronous>, transform_indices = @transform_2, window_bounds = array<i64: 1, 1>}, {transform_indices = @transform_3, window_bounds = array<i64: 1, 128>}]} {
    %c0 = arith.constant 0 : index
    %c0_0 = arith.constant 0 : index
    %0 = vector.load %arg1[%c0, %c0_0] : memref<128x256xf32, #tpu.memory_space<vmem>>, vector<128x256xf32>
    %c0_1 = arith.constant 0 : index
    %c0_2 = arith.constant 0 : index
    %1 = vector.load %arg2[%c0_1, %c0_2] : memref<256x1xf32, #tpu.memory_space<vmem>>, vector<256x1xf32>
    %cst = arith.constant dense<0.000000e+00> : vector<128x1xf32>
    %2 = tpu.matmul %0, %1, %cst {dimension_numbers = #tpu.dot_dimension_numbers<[1], [0], [0], [1], [0, 0, 1, 1], [], []>} : vector<128x256xf32>, vector<256x1xf32>, vector<128x1xf32> -> vector<128x1xf32>
    %c0_3 = arith.constant 0 : index
    %c0_4 = arith.constant 0 : index
    %3 = vector.load %arg3[%c0_3, %c0_4] : memref<1x1xf32, #tpu.memory_space<vmem>>, vector<1x1xf32>
    %4 = vector.broadcast %3 : vector<1x1xf32> to vector<128x1xf32>
    %5 = arith.addf %2, %4 : vector<128x1xf32>
    %6 = tpu.transpose %5, [1, 0] : vector<128x1xf32> -> vector<1x128xf32>
    %c0_5 = arith.constant 0 : index
    %c0_6 = arith.constant 0 : index
    %7 = vector.load %arg4[%c0_5, %c0_6] : memref<1x128xf32, #tpu.memory_space<vmem>>, vector<1x128xf32>
    tpu.vector_store %arg4[%c0_5, %c0_6], %6 {strides = array<i32>} : memref<1x128xf32, #tpu.memory_space<vmem>>, vector<1x128xf32>,
    return
  }
  func.func @transform_0(%arg0: i32) -> (i32, i32) {
    %c0_i32 = arith.constant 0 : i32
    %c0_i32_0 = arith.constant 0 : i32
    return %arg0, %c0_i32 : i32, i32
  }
  func.func @transform_1(%arg0: i32) -> (i32, i32) {
    %c0_i32 = arith.constant 0 : i32
    %c0_i32_0 = arith.constant 0 : i32
    %c0_i32_1 = arith.constant 0 : i32
    return %c0_i32, %c0_i32_0 : i32, i32
  }
  func.func @transform_2(%arg0: i32) -> (i32, i32) {
    %c0_i32 = arith.constant 0 : i32
    %c0_i32_0 = arith.constant 0 : i32
    %c0_i32_1 = arith.constant 0 : i32
    return %c0_i32, %c0_i32_0 : i32, i32
  }
  func.func @transform_3(%arg0: i32) -> (i32, i32) {
    %c0_i32 = arith.constant 0 : i32
    %c0_i32_0 = arith.constant 0 : i32
    return %c0_i32, %arg0 : i32, i32
  }
}

</mosaic_0001>

<bundles_post_ra>
// kernel: tpu_custom_call.1
= control target key start
LH: loop header
LB: loop body
LE: loop exit
PB: predicated region body
PF: predicated region fallthrough
CT: control target
= control target key end

     0   :  { %s680_s0 = inlined_call_operand.vmem [shape: f32[8,256], index: 0, kind: input, shape index: {}]   ;;  %s681_s1 = inlined_call_operand.vmem [shape: f32[256,1], index: 1, kind: input, shape index: {}]   ;;  %s682_s2 = inlined_call_operand.<no memory space> [shape: f32[1,1], index: 2, kind: input, shape index: {}]   ;;  %s683_s3 = inlined_call_operand.hbm [shape: f32[1,128], index: 3, kind: output, shape index: {}]  }
   0x1   :  { %v8_v0 = vstv %s682_s2 }
   0x2   :  { %9 = vst [vmem:[#allocation2] sm:$0x1] %v8_v0 }
   0x3   :  { %v65_v1 = vld [vmem:[%s681_s1 + $0x80] sm:$0xff]  ;;  %v66_v2 = vld [vmem:[%s681_s1 + $0x88] sm:$0xff]  ;;  %v67_v6 = vld [vmem:[%s681_s1 + $0x90] sm:$0xff] }
   0x4   :  { %v49_v3 = vld [vmem:[%s681_s1] sm:$0xff]  ;;  %v361_v4 = vpack.c.bf16 %v66_v2, %v65_v1  ;;  %v50_v5 = vld [vmem:[%s681_s1 + $0x8] sm:$0xff]  ;;  %v68_v7 = vld [vmem:[%s681_s1 + $0x98] sm:$0xff] }
   0x5   :  { %v363_v8 = vpack.c.bf16 %v50_v5, %v49_v3  ;;  %v365_v9 = vpack.c.bf16 %v68_v7, %v67_v6  ;;  %v51_v10 = vld [vmem:[%s681_s1 + $0x10] sm:$0xff]  ;;  %v52_v11 = vld [vmem:[%s681_s1 + $0x18] sm:$0xff]  ;;  %v69_v12 = vld [vmem:[%s681_s1 + $0xa0] sm:$0xff] }
   0x6   :  { %362 = vmatprep.subr.bf16.mxu0 %v361_v4  ;;  %v70_v13 = vld [vmem:[%s681_s1 + $0xa8] sm:$0xff]  ;;  %393 = vmatprep.subr.bf16.mxu1 %v361_v4  ;;  %v367_v14 = vpack.c.bf16 %v52_v11, %v51_v10  ;;  %v53_v16 = vld [vmem:[%s681_s1 + $0x20] sm:$0xff]  ;;  %v71_v18 = vld [vmem:[%s681_s1 + $0xb0] sm:$0xff] }
   0x7   :  { %364 = vmatpush3.bf16.msra.mxu0 %v363_v8  ;;  %401 = vmatpush3.bf16.msra.mxu1 %v363_v8  ;;  %v369_v15 = vpack.c.bf16 %v70_v13, %v69_v12  ;;  %v54_v17 = vld [vmem:[%s681_s1 + $0x28] sm:$0xff]  ;;  %v72_v19 = vld [vmem:[%s681_s1 + $0xb8] sm:$0xff]  ;;  %v55_v22 = vld [vmem:[%s681_s1 + $0x30] sm:$0xff] }
   0x8   :  { %366 = vmatprep.subr.bf16.mxu0 %v365_v9  ;;  %394 = vmatprep.subr.bf16.mxu1 %v365_v9  ;;  %v371_v20 = vpack.c.bf16 %v54_v17, %v53_v16  ;;  %v373_v21 = vpack.c.bf16 %v72_v19, %v71_v18  ;;  %v56_v23 = vld [vmem:[%s681_s1 + $0x38] sm:$0xff]  ;;  %v73_v24 = vld [vmem:[%s681_s1 + $0xc0] sm:$0xff]  ;;  %v74_v25 = vld [vmem:[%s681_s1 + $0xc8] sm:$0xff] }
   0x9   :  { %v18_v26 = vld [vmem:[%s680_s0 + $0x8] sm:$0xff]  ;;  %v375_v27 = vpack.c.bf16 %v56_v23, %v55_v22  ;;  %v377_v28 = vpack.c.bf16 %v74_v25, %v73_v24  ;;  %v57_v29 = vld [vmem:[%s681_s1 + $0x40] sm:$0xff]  ;;  %v75_v31 = vld [vmem:[%s681_s1 + $0xd0] sm:$0xff] }
   0xa   :  { %152 = vmatprep.mubr.f32.mxu0 %v18_v26  ;;  %v58_v30 = vld [vmem:[%s681_s1 + $0x48] sm:$0xff]  ;;  %v76_v32 = vld [vmem:[%s681_s1 + $0xd8] sm:$0xff]  ;;  %v59_v36 = vld [vmem:[%s681_s1 + $0x50] sm:$0xff] }
   0xb   :  { %368 = vmatpush3.bf16.msra.mxu0 %v367_v14  ;;  %402 = vmatpush3.bf16.msra.mxu1 %v367_v14  ;;  %v379_v33 = vpack.c.bf16 %v58_v30, %v57_v29  ;;  %v34_v34 = vld [vmem:[%s680_s0 + $0x88] sm:$0xff]  ;;  %v381_v35 = vpack.c.bf16 %v76_v32, %v75_v31  ;;  %v60_v37 = vld [vmem:[%s681_s1 + $0x58] sm:$0xff]  ;;  %v77_v38 = vld [vmem:[%s681_s1 + $0xe0] sm:$0xff] }
   0xc   :  { %370 = vmatprep.subr.bf16.mxu0 %v369_v15  ;;  %395 = vmatprep.subr.bf16.mxu1 %v369_v15  ;;  %v78_v39 = vld [vmem:[%s681_s1 + $0xe8] sm:$0xff]  ;;  %v383_v40 = vpack.c.bf16 %v60_v37, %v59_v36  ;;  %v61_v42 = vld [vmem:[%s681_s1 + $0x60] sm:$0xff] }
   0xd   :  { %192 = vmatprep.mubr.f32.mxu1 %v34_v34  ;;  %v385_v41 = vpack.c.bf16 %v78_v39, %v77_v38  ;;  %v62_v43 = vld [vmem:[%s681_s1 + $0x68] sm:$0xff] }
   0xf   :  { %372 = vmatpush3.bf16.msra.mxu0 %v371_v20  ;;  %403 = vmatpush3.bf16.msra.mxu1 %v371_v20 }
  0x10   :  { %374 = vmatprep.subr.bf16.mxu0 %v373_v21  ;;  %396 = vmatprep.subr.bf16.mxu1 %v373_v21 }
  0x13   :  { %376 = vmatpush3.bf16.msra.mxu0 %v375_v27  ;;  %404 = vmatpush3.bf16.msra.mxu1 %v375_v27 }
  0x14   :  { %378 = vmatprep.subr.bf16.mxu0 %v377_v28  ;;  %397 = vmatprep.subr.bf16.mxu1 %v377_v28 }
  0x17   :  { %380 = vmatpush3.bf16.msra.mxu0 %v379_v33  ;;  %405 = vmatpush3.bf16.msra.mxu1 %v379_v33 }
  0x18   :  { %382 = vmatprep.subr.bf16.mxu0 %v381_v35  ;;  %398 = vmatprep.subr.bf16.mxu1 %v381_v35 }
  0x19   :  { %10 = vsyncpa [#allocation4], 0  ;;  %v79_v44 = vld [vmem:[%s681_s1 + $0xf0] sm:$0xff]  ;;  %v80_v45 = vld [vmem:[%s681_s1 + $0xf8] sm:$0xff]  ;;  %v387_v46 = vpack.c.bf16 %v62_v43, %v61_v42 }
  0x1a   :  { %v389_v47 = vpack.c.bf16 %v80_v45, %v79_v44  ;;  %v63_v48 = vld [vmem:[%s681_s1 + $0x70] sm:$0xff]  ;;  %v64_v49 = vld [vmem:[%s681_s1 + $0x78] sm:$0xff]  ;;  %v17_v51 = vld [vmem:[%s680_s0] sm:$0xff] }
  0x1b   :  { %384 = vmatpush3.bf16.msra.mxu0 %v383_v40  ;;  %406 = vmatpush3.bf16.msra.mxu1 %v383_v40  ;;  %v391_v50 = vpack.c.bf16 %v64_v49, %v63_v48  ;;  %v33_v52 = vld [vmem:[%s680_s0 + $0x80] sm:$0xff]  ;;  %v20_v53 = vld [vmem:[%s680_s0 + $0x18] sm:$0xff]  ;;  %v19_v55 = vld [vmem:[%s680_s0 + $0x10] sm:$0xff] }
  0x1c   :  { %386 = vmatprep.subr.bf16.mxu0 %v385_v41  ;;  %399 = vmatprep.subr.bf16.mxu1 %v385_v41  ;;  %v36_v54 = vld [vmem:[%s680_s0 + $0x98] sm:$0xff]  ;;  %v35_v56 = vld [vmem:[%s680_s0 + $0x90] sm:$0xff]  ;;  %v22_v57 = vld [vmem:[%s680_s0 + $0x28] sm:$0xff] }
  0x1d   :  { %v38_v58 = vld [vmem:[%s680_s0 + $0xa8] sm:$0xff]  ;;  %v21_v59 = vld [vmem:[%s680_s0 + $0x20] sm:$0xff]  ;;  %v24_v61 = vld [vmem:[%s680_s0 + $0x38] sm:$0xff] }
  0x1e   :  { %v37_v60 = vld [vmem:[%s680_s0 + $0xa0] sm:$0xff]  ;;  %v40_v62 = vld [vmem:[%s680_s0 + $0xb8] sm:$0xff]  ;;  %v23_v63 = vld [vmem:[%s680_s0 + $0x30] sm:$0xff] }
  0x1f   :  { %388 = vmatpush3.bf16.msra.mxu0 %v387_v46  ;;  %407 = vmatpush3.bf16.msra.mxu1 %v387_v46  ;;  %v39_v0 = vld [vmem:[%s680_s0 + $0xb0] sm:$0xff]  ;;  %v26_v1 = vld [vmem:[%s680_s0 + $0x48] sm:$0xff]  ;;  %v25_v3 = vld [vmem:[%s680_s0 + $0x40] sm:$0xff] }
  0x20   :  { %390 = vmatprep.subr.bf16.mxu0 %v389_v47  ;;  %400 = vmatprep.subr.bf16.mxu1 %v389_v47  ;;  %v42_v2 = vld [vmem:[%s680_s0 + $0xc8] sm:$0xff]  ;;  %v41_v4 = vld [vmem:[%s680_s0 + $0xc0] sm:$0xff]  ;;  %v28_v5 = vld [vmem:[%s680_s0 + $0x58] sm:$0xff] }
  0x21   :  { %v44_v6 = vld [vmem:[%s680_s0 + $0xd8] sm:$0xff]  ;;  %v27_v7 = vld [vmem:[%s680_s0 + $0x50] sm:$0xff]  ;;  %v30_v9 = vld [vmem:[%s680_s0 + $0x68] sm:$0xff] }
  0x22   :  { %v43_v8 = vld [vmem:[%s680_s0 + $0xd0] sm:$0xff]  ;;  %v46_v10 = vld [vmem:[%s680_s0 + $0xe8] sm:$0xff]  ;;  %v29_v11 = vld [vmem:[%s680_s0 + $0x60] sm:$0xff] }
  0x23   :  { %392 = vmatpush3.bf16.msra.mxu0 %v391_v50  ;;  %408 = vmatpush3.bf16.msra.mxu1 %v391_v50  ;;  %v45_v12 = vld [vmem:[%s680_s0 + $0xe0] sm:$0xff]  ;;  %v32_v13 = vld [vmem:[%s680_s0 + $0x78] sm:$0xff]  ;;  %v31_v15 = vld [vmem:[%s680_s0 + $0x70] sm:$0xff] }
  0x24   :  { %v48_v14 = vld [vmem:[%s680_s0 + $0xf8] sm:$0xff]  ;;  %v47_v16 = vld [vmem:[%s680_s0 + $0xf0] sm:$0xff]  ;;  %v650_v20 = vld [vmem:[#allocation2] ss:$0 sm:$0xff]  ;;  %s434_s0 = smov [#allocation3]  }
  0x25   :  { %s272_s27 = sshll.u32 %s434_s0, 4  ;;  %s273_s27 = int_to_ptr.vmem [resolvable:$true] %s272_s27 }
  0x26   :  { %153 = vmatmul.mubr.f32.vlgmr.msra.gmra.mrb[0].mxu0 %v17_v51  ;;  %193 = vmatmul.mubr.f32.vlgmr.msra.gmra.mrb[0].mxu1 %v33_v52  ;;  %s410_s28 = scalar_lea.vmem %s273_s27, 16  ;;  %s414_s29 = scalar_lea.vmem %s273_s27, 32 }
  0x27   :  { %157 = vmatprep.mubr.f32.mxu0 %v20_v53  ;;  %197 = vmatprep.mubr.f32.mxu1 %v36_v54  ;;  %p411_p0 = scmp.ne.s32.totalorder %s273_s27, %s410_s28  ;;  %p415_p1 = scmp.lt.s32.totalorder %s273_s27, %s273_s27 }
  0x28   :  { %p416_p2 = scmp.lt.s32.totalorder %s414_s29, %s410_s28 }
  0x2a   :  { %158 = vmatmul.mubr.f32.gmra.mrb[2].mxu0 %v19_v55  ;;  %198 = vmatmul.mubr.f32.gmra.mrb[2].mxu1 %v35_v56  ;;  %p417_p3 = por %p416_p2, %p415_p1 }
  0x2b   :  { %162 = vmatprep.mubr.f32.mxu0 %v22_v57  ;;  %202 = vmatprep.mubr.f32.mxu1 %v38_v58 }
  0x2c   :  { %p418_p4 = pnand %p417_p3, %p411_p0 }
  0x2e   :  { %163 = vmatmul.mubr.f32.gmra.mrb[4].mxu0 %v21_v59  ;;  %203 = vmatmul.mubr.f32.gmra.mrb[4].mxu1 %v37_v60 }
  0x2f   :  { %167 = vmatprep.mubr.f32.mxu0 %v24_v61  ;;  %207 = vmatprep.mubr.f32.mxu1 %v40_v62 }
  0x32   :  { %168 = vmatmul.mubr.f32.gmra.mrb[6].mxu0 %v23_v63  ;;  %208 = vmatmul.mubr.f32.gmra.mrb[6].mxu1 %v39_v0 }
  0x33   :  { %172 = vmatprep.mubr.f32.mxu0 %v26_v1  ;;  %212 = vmatprep.mubr.f32.mxu1 %v42_v2 }
  0x36   :  { %173 = vmatmul.mubr.f32.gmra.mrb[8].mxu0 %v25_v3  ;;  %213 = vmatmul.mubr.f32.gmra.mrb[8].mxu1 %v41_v4 }
  0x37   :  { %177 = vmatprep.mubr.f32.mxu0 %v28_v5  ;;  %217 = vmatprep.mubr.f32.mxu1 %v44_v6 }
  0x3a   :  { %178 = vmatmul.mubr.f32.gmra.mrb[10].mxu0 %v27_v7  ;;  %218 = vmatmul.mubr.f32.gmra.mrb[10].mxu1 %v43_v8 }
  0x3b   :  { %182 = vmatprep.mubr.f32.mxu0 %v30_v9  ;;  %222 = vmatprep.mubr.f32.mxu1 %v46_v10 }
  0x3e   :  { %183 = vmatmul.mubr.f32.gmra.mrb[12].mxu0 %v29_v11  ;;  %223 = vmatmul.mubr.f32.gmra.mrb[12].mxu1 %v45_v12 }
  0x3f   :  { %187 = vmatprep.mubr.f32.mxu0 %v32_v13  ;;  %227 = vmatprep.mubr.f32.mxu1 %v48_v14 }
  0x42   :  { %188 = vmatmul.mubr.f32.gmra.mrb[14].mxu0 %v31_v15  ;;  %228 = vmatmul.mubr.f32.gmra.mrb[14].mxu1 %v47_v16 }
  0xf9   :  { %v313_v17 = vpop.f32.mrb[0].mxu0  ;;  %v337_v18 = vpop.f32.mrb[0].mxu1 }
  0xfa   :  { %v314_v19 = vpop.f32.mrb[1].mxu0  ;;  %v338_v21 = vpop.f32.mrb[1].mxu1 }
  0xfb   :  { %v315_v22 = vadd.f32 %v314_v19, %v313_v17  ;;  %v339_v23 = vadd.f32 %v338_v21, %v337_v18 }
  0xfd   :  { %v316_v24 = vpop.f32.mrb[2].mxu0  ;;  %v155_v25 = vadd.f32 %v315_v22, %v650_v20  ;;  %v340_v26 = vpop.f32.mrb[2].mxu1  ;;  %v195_v10 = vadd.f32 %v339_v23, %v650_v20 }
  0xfe   :  { %v317_v27 = vpop.f32.mrb[3].mxu0  ;;  %v341_v28 = vpop.f32.mrb[3].mxu1 }
  0xff   :  { %v318_v29 = vadd.f32 %v317_v27, %v316_v24  ;;  %233 = vxpose.xlu0.b32.start [1/16] (narrow) %v155_v25, 8  ;;  %v342_v30 = vadd.f32 %v341_v28, %v340_v26 }
 0x101   :  { %v319_v31 = vpop.f32.mrb[4].mxu0  ;;  %v160_v32 = vadd.f32 %v318_v29, %v650_v20  ;;  %v343_v33 = vpop.f32.mrb[4].mxu1  ;;  %v200_v11 = vadd.f32 %v342_v30, %v650_v20 }
 0x102   :  { %v320_v34 = vpop.f32.mrb[5].mxu0  ;;  %v344_v35 = vpop.f32.mrb[5].mxu1 }
 0x103   :  { %v321_v36 = vadd.f32 %v320_v34, %v319_v31  ;;  %234 = vxpose.xlu0.b32.cont [2/16] (narrow) %v160_v32, 8  ;;  %v345_v37 = vadd.f32 %v344_v35, %v343_v33 }
 0x105   :  { %v322_v38 = vpop.f32.mrb[6].mxu0  ;;  %v165_v39 = vadd.f32 %v321_v36, %v650_v20  ;;  %v346_v40 = vpop.f32.mrb[6].mxu1  ;;  %v205_v12 = vadd.f32 %v345_v37, %v650_v20 }
 0x106   :  { %v323_v41 = vpop.f32.mrb[7].mxu0  ;;  %v347_v42 = vpop.f32.mrb[7].mxu1 }
 0x107   :  { %v324_v43 = vadd.f32 %v323_v41, %v322_v38  ;;  %235 = vxpose.xlu0.b32.cont [3/16] (narrow) %v165_v39, 8  ;;  %v348_v44 = vadd.f32 %v347_v42, %v346_v40 }
 0x109   :  { %v325_v45 = vpop.f32.mrb[8].mxu0  ;;  %v170_v46 = vadd.f32 %v324_v43, %v650_v20  ;;  %v349_v47 = vpop.f32.mrb[8].mxu1  ;;  %v210_v13 = vadd.f32 %v348_v44, %v650_v20 }
 0x10a   :  { %v326_v48 = vpop.f32.mrb[9].mxu0  ;;  %v350_v49 = vpop.f32.mrb[9].mxu1 }
 0x10b   :  { %v327_v50 = vadd.f32 %v326_v48, %v325_v45  ;;  %236 = vxpose.xlu0.b32.cont [4/16] (narrow) %v170_v46, 8  ;;  %v351_v51 = vadd.f32 %v350_v49, %v349_v47 }
 0x10d   :  { %v328_v52 = vpop.f32.mrb[10].mxu0  ;;  %v175_v53 = vadd.f32 %v327_v50, %v650_v20  ;;  %v352_v54 = vpop.f32.mrb[10].mxu1  ;;  %v215_v14 = vadd.f32 %v351_v51, %v650_v20 }
 0x10e   :  { %v329_v55 = vpop.f32.mrb[11].mxu0  ;;  %v353_v56 = vpop.f32.mrb[11].mxu1 }
 0x10f   :  { %v330_v57 = vadd.f32 %v329_v55, %v328_v52  ;;  %237 = vxpose.xlu0.b32.cont [5/16] (narrow) %v175_v53, 8  ;;  %v354_v58 = vadd.f32 %v353_v56, %v352_v54 }
 0x111   :  { %v331_v59 = vpop.f32.mrb[12].mxu0  ;;  %v180_v60 = vadd.f32 %v330_v57, %v650_v20  ;;  %v355_v61 = vpop.f32.mrb[12].mxu1  ;;  %v220_v15 = vadd.f32 %v354_v58, %v650_v20 }
 0x112   :  { %v332_v62 = vpop.f32.mrb[13].mxu0  ;;  %v356_v63 = vpop.f32.mrb[13].mxu1 }
 0x113   :  { %v333_v0 = vadd.f32 %v332_v62, %v331_v59  ;;  %238 = vxpose.xlu0.b32.cont [6/16] (narrow) %v180_v60, 8  ;;  %v357_v1 = vadd.f32 %v356_v63, %v355_v61 }
 0x115   :  { %v334_v2 = vpop.f32.mrb[14].mxu0  ;;  %v185_v3 = vadd.f32 %v333_v0, %v650_v20  ;;  %v358_v4 = vpop.f32.mrb[14].mxu1  ;;  %v225_v16 = vadd.f32 %v357_v1, %v650_v20 }
 0x116   :  { %v335_v5 = vpop.f32.mrb[15].mxu0  ;;  %v359_v6 = vpop.f32.mrb[15].mxu1 }
 0x117   :  { %v336_v7 = vadd.f32 %v335_v5, %v334_v2  ;;  %239 = vxpose.xlu0.b32.cont [7/16] (narrow) %v185_v3, 8  ;;  %v360_v8 = vadd.f32 %v359_v6, %v358_v4 }
 0x119   :  { %v190_v9 = vadd.f32 %v336_v7, %v650_v20  ;;  %v230_v17 = vadd.f32 %v360_v8, %v650_v20 }
 0x11b   :  { %240 = vxpose.xlu0.b32.cont [8/16] (narrow) %v190_v9, 8 }
 0x11f   :  { %241 = vxpose.xlu0.b32.cont [9/16] (narrow) %v195_v10, 8 }
 0x123   :  { %242 = vxpose.xlu0.b32.cont [10/16] (narrow) %v200_v11, 8 }
 0x127   :  { %243 = vxpose.xlu0.b32.cont [11/16] (narrow) %v205_v12, 8 }
 0x12b   :  { %244 = vxpose.xlu0.b32.cont [12/16] (narrow) %v210_v13, 8 }
 0x12f   :  { %245 = vxpose.xlu0.b32.cont [13/16] (narrow) %v215_v14, 8 }
 0x133   :  { %246 = vxpose.xlu0.b32.cont [14/16] (narrow) %v220_v15, 8 }
 0x137   :  { %247 = vxpose.xlu0.b32.cont [15/16] (narrow) %v225_v16, 8 }
 0x13b   :  { %248 = vxpose.xlu0.b32.end [16/16] (narrow) %v230_v17, 8 }
 0x17f   :  { %v249_v18 = vpop.trf.xlu0 }
 0x180   :  { %265 = vst [vmem:[#allocation3] sm:$0x1] %v249_v18 }
 0x181   :  { %421 = shalt.err (!%p418_p4)
}
 0x182   :  { %s422_s4 = scalar_lea.hbm %s683_s3, 16 }
 0x183   :  { %p423_p5 = scmp.ne.s32.totalorder %s683_s3, %s422_s4  ;;  %p426_p6 = scmp.lt.u32.totalorder %s422_s4, %s683_s3 }
 0x185   :  { %p428_p7 = pnand %p426_p6, %p423_p5 }
 0x187   :  { %431 = shalt.err (!%p428_p7)
}
 0x188   :  { %275 = dma.vmem_to_hbm [thread:$0]  %s273_s27, 16, %s683_s3, [#allocation4]  }
 0x189   :  { %432 = dma.done.wait [#allocation4], 16  }
 0x18a   :  { %433 = vsyncadd [#allocation4], 4294967280 }
 0x18b   :  { %279 = vsyncpa [#allocation4], 1 }

</bundles_post_ra>
